<compile_context>
chip_gen: v5e
topology: v5e:2x2
jax: 0.10.0
libtpu: 0.0.40
codegen_flags: <defaults>
</compile_context>

<pallas_src>
import functools
import math

import jax
import jax.numpy as jnp
from jax.experimental import pallas as pl
from jax.experimental.pallas import tpu as pltpu


def _vfe_kernel(x_ref, w_ref, out_ref,
                sum_ref, sumsq_ref, scale_ref, shift_ref,
                *, n_rows_total, seq_len, batch_per_tile, eps):
    # x_ref  : (TR, C)   current row tile of the flattened (B*N, C) input
    # w_ref  : (C, D)    stacked W^T for all nodes, D = nodes*C (resident)
    # out_ref: (B, D)    lane-dense output slab (resident, constant index_map)
    # scratch: per-column stats accumulators + normalize constants, all (1, D)
    p = pl.program_id(0)      # 0 = stats pass, 1 = normalize pass
    t = pl.program_id(1)      # row-tile index

    @pl.when((p == 0) & (t == 0))
    def _init_stats():
        sum_ref[...] = jnp.zeros_like(sum_ref)
        sumsq_ref[...] = jnp.zeros_like(sumsq_ref)

    # Fused Linear for all nodes: one MXU pass per tile, 128-wide output lanes.
    # Bias dropped (cancels under training-mode BN with gamma=1, beta=0).
    y = jnp.dot(x_ref[...].astype(jnp.float32),
                w_ref[...].astype(jnp.float32),
                preferred_element_type=jnp.float32)              # (TR, D)

    @pl.when(p == 0)
    def _accumulate_stats():
        sum_ref[...] += jnp.sum(y, axis=0, keepdims=True)
        sumsq_ref[...] += jnp.sum(y * y, axis=0, keepdims=True)

    @pl.when((p == 1) & (t == 0))
    def _finalize_stats():
        inv_r = 1.0 / n_rows_total
        mu = sum_ref[...] * inv_r
        var = sumsq_ref[...] * inv_r - mu * mu                   # biased var
        scale = jax.lax.rsqrt(var + eps)
        scale_ref[...] = scale
        shift_ref[...] = mu * scale

    @pl.when(p == 1)
    def _normalize_and_reduce():
        yr = jnp.maximum(y * scale_ref[...] - shift_ref[...], 0.0)  # (TR, D)
        # Mean over the sequence axis for the batch elements covered by this
        # tile (row_tile is a multiple of seq_len, so the reshape is a pure
        # relayout for sublane-aligned seq_len).
        means = jnp.sum(
            yr.reshape(batch_per_tile, seq_len, yr.shape[-1]), axis=1
        ) * (1.0 / seq_len)                                         # (bt, D)
        out_ref[pl.ds(t * batch_per_tile, batch_per_tile), :] = (
            means.astype(out_ref.dtype))


def _pick_row_tile(n_rows, seq_len, target=2048):
    """Largest row tile <= target that divides n_rows, covers whole sequences
    (multiple of seq_len), and keeps sublane alignment (multiple of 8 or the
    full array)."""
    best = n_rows
    tile = seq_len
    limit = min(n_rows, max(target, seq_len))
    while tile <= limit:
        if n_rows % tile == 0 and (tile % 8 == 0 or tile == n_rows):
            best = tile
        tile += seq_len
    return best


def vfe_forward(x, weights, biases=None, *, row_tile=None):
    """x: (B, N, C); weights: (nodes, C, C) [PyTorch Linear weight layout];
    biases: (nodes, C) — accepted for API parity but unused: the Linear bias
    cancels exactly under training-mode BatchNorm (mean subtraction, gamma=1,
    beta=0).  Returns f_v: (B, nodes, C)."""
    del biases  # cancels algebraically; never touches the TPU
    B, N, C = x.shape
    nodes = weights.shape[0]
    D = nodes * C
    R = B * N

    if row_tile is None:
        row_tile = _pick_row_tile(R, N)
    assert R % row_tile == 0 and row_tile % N == 0, (R, N, row_tile)
    n_tiles = R // row_tile
    batch_per_tile = row_tile // N

    # Wrapper-side layout plumbing (free):
    #   W_stacked[c_in, i*C + c_out] = weights[i, c_out, c_in]  (= W_i^T cols)
    w_stacked = jnp.transpose(weights, (2, 0, 1)).reshape(C, D)
    x_flat = x.reshape(R, C)

    kernel = functools.partial(
        _vfe_kernel,
        n_rows_total=R, seq_len=N, batch_per_tile=batch_per_tile, eps=1e-5)

    out = pl.pallas_call(
        kernel,
        out_shape=jax.ShapeDtypeStruct((B, D), x.dtype),
        grid_spec=pltpu.PrefetchScalarGridSpec(
            num_scalar_prefetch=0,
            grid=(2, n_tiles),                      # (pass, row tile)
            in_specs=[
                # x row tile: re-streamed once per pass (double-buffered DMA).
                pl.BlockSpec((row_tile, C), lambda p, t: (t, 0)),
                # stacked W^T: constant index_map -> fetched once, resident.
                pl.BlockSpec((C, D), lambda p, t: (0, 0)),
            ],
            # Output slab resident across the whole grid; written in pass 1.
            out_specs=pl.BlockSpec((B, D), lambda p, t: (0, 0)),
            scratch_shapes=[
                pltpu.VMEM((1, D), jnp.float32),   # per-column sum
                pltpu.VMEM((1, D), jnp.float32),   # per-column sum of squares
                pltpu.VMEM((1, D), jnp.float32),   # scale = rsqrt(var + eps)
                pltpu.VMEM((1, D), jnp.float32),   # shift = mean * scale
            ]),
        compiler_params=pltpu.CompilerParams(
            # Both axes carry accumulator state -> "arbitrary".
            # TODO(synk): add a leading "parallel" axis over the D columns to
            # use v7x's second TensorCore at production shapes.
            dimension_semantics=("arbitrary", "arbitrary"),
            vmem_limit_bytes=32 * 1024 * 1024),
    )(x_flat, w_stacked)

    # Free reshape to the PyTorch output layout (nodes*C is contiguous).
    return out.reshape(B, nodes, C)


def vfe_reference(x, weights, biases):
    """Pure-JAX reference mirroring the PyTorch forward (bias included)."""
    outs = []
    for i in range(weights.shape[0]):
        y = jnp.einsum("bnc,dc->bnd", x, weights[i]) + biases[i]
        mean = jnp.mean(y, axis=(0, 1), keepdims=True)
        var = jnp.mean((y - mean) ** 2, axis=(0, 1), keepdims=True)
        yn = (y - mean) / jnp.sqrt(var + 1e-5)
        yr = jnp.maximum(yn, 0.0)
        outs.append(jnp.mean(yr, axis=1))           # (B, C)
    return jnp.stack(outs, axis=1)                  # (B, nodes, C)


if __name__ == "__main__":
    # Small shapes: batch=2, seq(points)=8, in_channels=32, nodes=4
    # -> fused lane width nodes*C = 128 (exactly one vreg lane span).
    B, N, C, NODES = 2, 8, 32, 4

    key = jax.random.PRNGKey(0)
    kx, kw, kb = jax.random.split(key, 3)

    x = jax.random.normal(kx, (B, N, C), dtype=jnp.float32)

    # fc.weight ~ normal(0, sqrt(2/out_features)); fc.bias ~ U(-1/sqrt(C), 1/sqrt(C))
    weights = jax.random.normal(kw, (NODES, C, C), dtype=jnp.float32) * math.sqrt(2.0 / C)
    biases = jax.random.uniform(
        kb, (NODES, C), dtype=jnp.float32,
        minval=-1.0 / math.sqrt(C), maxval=1.0 / math.sqrt(C))
    # bn.weight = 1, bn.bias = 0  -> identity affine, folded out of the kernel.

    # row_tile=8 -> two row tiles per pass: exercises the tiled two-pass
    # stats/normalize pipeline even at the tiny demo shape.
    f_v = vfe_forward(x, weights, biases, row_tile=8)
    f_v = jax.block_until_ready(f_v)

    ref = vfe_reference(x, weights, biases)
    assert f_v.shape == (B, NODES, C)
    assert jnp.allclose(f_v, ref, atol=1e-4, rtol=1e-4)

    print("KERNEL_OK")
</pallas_src>

<mosaic_0001>
module attributes {stable_mosaic.version = 11 : i64} {
  func.func @_vfe_kernel(%arg0: i32, %arg1: i32, %arg2: memref<8x32xf32, #tpu.memory_space<vmem>>, %arg3: memref<32x128xf32, #tpu.memory_space<vmem>>, %arg4: memref<2x128xf32, #tpu.memory_space<vmem>>, %arg5: memref<1x128xf32, #tpu.memory_space<vmem>>, %arg6: memref<1x128xf32, #tpu.memory_space<vmem>>, %arg7: memref<1x128xf32, #tpu.memory_space<vmem>>, %arg8: memref<1x128xf32, #tpu.memory_space<vmem>>) attributes {dimension_semantics = [#tpu.dimension_semantics<arbitrary>, #tpu.dimension_semantics<arbitrary>], iteration_bounds = array<i64: 2, 2>, scalar_prefetch = 0 : i64, scratch_operands = 4 : i64, tpu.core_type = #tpu.core_type<tc>, window_params = [{transform_indices = @transform_0, window_bounds = array<i64: 8, 32>}, {pipeline_mode = #tpu.pipeline_mode<synchronous>, transform_indices = @transform_1, window_bounds = array<i64: 32, 128>}, {pipeline_mode = #tpu.pipeline_mode<synchronous>, transform_indices = @transform_2, window_bounds = array<i64: 2, 128>}]} {
    %c0_i32 = arith.constant 0 : i32
    %0 = arith.cmpi eq, %arg0, %c0_i32 : i32
    %c0_i32_0 = arith.constant 0 : i32
    %1 = arith.cmpi eq, %arg1, %c0_i32_0 : i32
    %2 = arith.andi %0, %1 : i1
    %3 = arith.extui %2 : i1 to i32
    %c0_i32_1 = arith.constant 0 : i32
    %4 = arith.cmpi ne, %3, %c0_i32_1 : i32
    scf.if %4 {
      %cst_11 = arith.constant 0.000000e+00 : f32
      %19 = vector.broadcast %cst_11 : f32 to vector<1x128xf32>
      %c0_12 = arith.constant 0 : index
      %c0_13 = arith.constant 0 : index
      %20 = vector.load %arg5[%c0_12, %c0_13] : memref<1x128xf32, #tpu.memory_space<vmem>>, vector<1x128xf32>
      tpu.vector_store %arg5[%c0_12, %c0_13], %19 {strides = array<i32>} : memref<1x128xf32, #tpu.memory_space<vmem>>, vector<1x128xf32>,
      %cst_14 = arith.constant 0.000000e+00 : f32
      %21 = vector.broadcast %cst_14 : f32 to vector<1x128xf32>
      %c0_15 = arith.constant 0 : index
      %c0_16 = arith.constant 0 : index
      %22 = vector.load %arg6[%c0_15, %c0_16] : memref<1x128xf32, #tpu.memory_space<vmem>>, vector<1x128xf32>
      tpu.vector_store %arg6[%c0_15, %c0_16], %21 {strides = array<i32>} : memref<1x128xf32, #tpu.memory_space<vmem>>, vector<1x128xf32>,
    } else {
    }
    %c0 = arith.constant 0 : index
    %c0_2 = arith.constant 0 : index
    %5 = vector.load %arg2[%c0, %c0_2] : memref<8x32xf32, #tpu.memory_space<vmem>>, vector<8x32xf32>
    %c0_3 = arith.constant 0 : index
    %c0_4 = arith.constant 0 : index
    %6 = vector.load %arg3[%c0_3, %c0_4] : memref<32x128xf32, #tpu.memory_space<vmem>>, vector<32x128xf32>
    %cst = arith.constant dense<0.000000e+00> : vector<8x128xf32>
    %7 = tpu.matmul %5, %6, %cst {dimension_numbers = #tpu.dot_dimension_numbers<[1], [0], [0], [1], [0, 0, 1, 1], [], []>} : vector<8x32xf32>, vector<32x128xf32>, vector<8x128xf32> -> vector<8x128xf32>
    %c0_i32_5 = arith.constant 0 : i32
    %8 = arith.cmpi eq, %arg0, %c0_i32_5 : i32
    %9 = arith.extui %8 : i1 to i32
    %c0_i32_6 = arith.constant 0 : i32
    %10 = arith.cmpi ne, %9, %c0_i32_6 : i32
    scf.if %10 {
      %c0_11 = arith.constant 0 : index
      %c0_12 = arith.constant 0 : index
      %19 = vector.load %arg5[%c0_11, %c0_12] : memref<1x128xf32, #tpu.memory_space<vmem>>, vector<1x128xf32>
      %cst_13 = arith.constant dense<0.000000e+00> : vector<128xf32>
      %20 = vector.multi_reduction <add>, %7, %cst_13 [0] : vector<8x128xf32> to vector<128xf32>
      %21 = vector.shape_cast %20 : vector<128xf32> to vector<1x128xf32>
      %22 = arith.addf %19, %21 : vector<1x128xf32>
      %c0_14 = arith.constant 0 : index
      %c0_15 = arith.constant 0 : index
      %23 = vector.load %arg5[%c0_14, %c0_15] : memref<1x128xf32, #tpu.memory_space<vmem>>, vector<1x128xf32>
      tpu.vector_store %arg5[%c0_14, %c0_15], %22 {strides = array<i32>} : memref<1x128xf32, #tpu.memory_space<vmem>>, vector<1x128xf32>,
      %c0_16 = arith.constant 0 : index
      %c0_17 = arith.constant 0 : index
      %24 = vector.load %arg6[%c0_16, %c0_17] : memref<1x128xf32, #tpu.memory_space<vmem>>, vector<1x128xf32>
      %25 = arith.mulf %7, %7 : vector<8x128xf32>
      %cst_18 = arith.constant dense<0.000000e+00> : vector<128xf32>
      %26 = vector.multi_reduction <add>, %25, %cst_18 [0] : vector<8x128xf32> to vector<128xf32>
      %27 = vector.shape_cast %26 : vector<128xf32> to vector<1x128xf32>
      %28 = arith.addf %24, %27 : vector<1x128xf32>
      %c0_19 = arith.constant 0 : index
      %c0_20 = arith.constant 0 : index
      %29 = vector.load %arg6[%c0_19, %c0_20] : memref<1x128xf32, #tpu.memory_space<vmem>>, vector<1x128xf32>
      tpu.vector_store %arg6[%c0_19, %c0_20], %28 {strides = array<i32>} : memref<1x128xf32, #tpu.memory_space<vmem>>, vector<1x128xf32>,
    } else {
    }
    %c1_i32 = arith.constant 1 : i32
    %11 = arith.cmpi eq, %arg0, %c1_i32 : i32
    %c0_i32_7 = arith.constant 0 : i32
    %12 = arith.cmpi eq, %arg1, %c0_i32_7 : i32
    %13 = arith.andi %11, %12 : i1
    %14 = arith.extui %13 : i1 to i32
    %c0_i32_8 = arith.constant 0 : i32
    %15 = arith.cmpi ne, %14, %c0_i32_8 : i32
    scf.if %15 {
      %c0_11 = arith.constant 0 : index
      %c0_12 = arith.constant 0 : index
      %19 = vector.load %arg5[%c0_11, %c0_12] : memref<1x128xf32, #tpu.memory_space<vmem>>, vector<1x128xf32>
      %cst_13 = arith.constant 6.250000e-02 : f32
      %20 = vector.broadcast %cst_13 : f32 to vector<1x128xf32>
      %21 = arith.mulf %19, %20 : vector<1x128xf32>
      %c0_14 = arith.constant 0 : index
      %c0_15 = arith.constant 0 : index
      %22 = vector.load %arg6[%c0_14, %c0_15] : memref<1x128xf32, #tpu.memory_space<vmem>>, vector<1x128xf32>
      %cst_16 = arith.constant 6.250000e-02 : f32
      %23 = vector.broadcast %cst_16 : f32 to vector<1x128xf32>
      %24 = arith.mulf %22, %23 : vector<1x128xf32>
      %25 = arith.mulf %21, %21 : vector<1x128xf32>
      %26 = arith.subf %24, %25 : vector<1x128xf32>
      %cst_17 = arith.constant 9.99999974E-6 : f32
      %27 = vector.broadcast %cst_17 : f32 to vector<1x128xf32>
      %28 = arith.addf %26, %27 : vector<1x128xf32>
      %29 = math.rsqrt %28 : vector<1x128xf32>
      %c0_18 = arith.constant 0 : index
      %c0_19 = arith.constant 0 : index
      %30 = vector.load %arg7[%c0_18, %c0_19] : memref<1x128xf32, #tpu.memory_space<vmem>>, vector<1x128xf32>
      tpu.vector_store %arg7[%c0_18, %c0_19], %29 {strides = array<i32>} : memref<1x128xf32, #tpu.memory_space<vmem>>, vector<1x128xf32>,
      %31 = arith.mulf %21, %29 : vector<1x128xf32>
      %c0_20 = arith.constant 0 : index
      %c0_21 = arith.constant 0 : index
      %32 = vector.load %arg8[%c0_20, %c0_21] : memref<1x128xf32, #tpu.memory_space<vmem>>, vector<1x128xf32>
      tpu.vector_store %arg8[%c0_20, %c0_21], %31 {strides = array<i32>} : memref<1x128xf32, #tpu.memory_space<vmem>>, vector<1x128xf32>,
    } else {
    }
    %c1_i32_9 = arith.constant 1 : i32
    %16 = arith.cmpi eq, %arg0, %c1_i32_9 : i32
    %17 = arith.extui %16 : i1 to i32
    %c0_i32_10 = arith.constant 0 : i32
    %18 = arith.cmpi ne, %17, %c0_i32_10 : i32
    scf.if %18 {
      %c0_11 = arith.constant 0 : index
      %c0_12 = arith.constant 0 : index
      %19 = vector.load %arg7[%c0_11, %c0_12] : memref<1x128xf32, #tpu.memory_space<vmem>>, vector<1x128xf32>
      %20 = vector.broadcast %19 : vector<1x128xf32> to vector<8x128xf32>
      %21 = arith.mulf %7, %20 : vector<8x128xf32>
      %c0_13 = arith.constant 0 : index
      %c0_14 = arith.constant 0 : index
      %22 = vector.load %arg8[%c0_13, %c0_14] : memref<1x128xf32, #tpu.memory_space<vmem>>, vector<1x128xf32>
      %23 = vector.broadcast %22 : vector<1x128xf32> to vector<8x128xf32>
      %24 = arith.subf %21, %23 : vector<8x128xf32>
      %cst_15 = arith.constant 0.000000e+00 : f32
      %25 = vector.broadcast %cst_15 : f32 to vector<8x128xf32>
      %26 = arith.maximumf %24, %25 : vector<8x128xf32>
      %27 = vector.shape_cast %26 : vector<8x128xf32> to vector<1x8x128xf32>
      %cst_16 = arith.constant dense<0.000000e+00> : vector<1x128xf32>
      %28 = vector.multi_reduction <add>, %27, %cst_16 [1] : vector<1x8x128xf32> to vector<1x128xf32>
      %cst_17 = arith.constant 1.250000e-01 : f32
      %29 = vector.broadcast %cst_17 : f32 to vector<1x128xf32>
      %30 = arith.mulf %28, %29 : vector<1x128xf32>
      %c1_i32_18 = arith.constant 1 : i32
      %31 = arith.muli %arg1, %c1_i32_18 : i32
      %32 = arith.index_cast %31 : i32 to index
      %c0_19 = arith.constant 0 : index
      %33 = vector.load %arg4[%32, %c0_19] : memref<2x128xf32, #tpu.memory_space<vmem>>, vector<1x128xf32>
      tpu.vector_store %arg4[%32, %c0_19], %30 {strides = array<i32>} : memref<2x128xf32, #tpu.memory_space<vmem>>, vector<1x128xf32>,
    } else {
    }
    return
  }
  func.func @transform_0(%arg0: i32, %arg1: i32) -> (i32, i32) {
    %c0_i32 = arith.constant 0 : i32
    %c0_i32_0 = arith.constant 0 : i32
    return %arg1, %c0_i32 : i32, i32
  }
  func.func @transform_1(%arg0: i32, %arg1: i32) -> (i32, i32) {
    %c0_i32 = arith.constant 0 : i32
    %c0_i32_0 = arith.constant 0 : i32
    %c0_i32_1 = arith.constant 0 : i32
    return %c0_i32, %c0_i32_0 : i32, i32
  }
  func.func @transform_2(%arg0: i32, %arg1: i32) -> (i32, i32) {
    %c0_i32 = arith.constant 0 : i32
    %c0_i32_0 = arith.constant 0 : i32
    %c0_i32_1 = arith.constant 0 : i32
    return %c0_i32, %c0_i32_0 : i32, i32
  }
}

</mosaic_0001>

<bundles_post_ra>
// kernel: tpu_custom_call.1
= control target key start
LH: loop header
LB: loop body
LE: loop exit
PB: predicated region body
PF: predicated region fallthrough
CT: control target
= control target key end

     0   :  { %7 = vsyncpa [#allocation7], 0  ;;  %s803_s0 = inlined_call_operand.hbm [shape: f32[16,32], index: 0, kind: input, shape index: {}]   ;;  %s804_s1 = inlined_call_operand.hbm [shape: f32[32,128], index: 1, kind: input, shape index: {}]   ;;  %s805_s2 = inlined_call_operand.hbm [shape: f32[2,128], index: 2, kind: output, shape index: {}]  }
   0x1   :  { %9 = vsyncpa [#allocation7 + $0x1], 0 }
   0x2   :  { %10 = vsyncpa [#allocation10], 0 }
   0x3   :  { %11 = vsyncpa [#allocation8], 0  ;;  %s663_s9 = smov 0   ;;  %s665_s10 = smov 0  }
   0x4   :  { %s667_s11 = smov 0   ;;  %s669_s12 = smov 0  }
   0x5   :  { %s671_s13 = smov 0   ;;  %s673_s14 = smov 0  }
   0x6   :  { %s675_s15 = smov 0   ;;  %s677_s16 = smov 0  }
   0x7 LB: > { %s367_s17 = sadd.s32 4294967295, %s641_s16   ;;  %p368_p0 = scmp.ge.s32.totalorder %s641_s16, 1  ;;  %s641_s16 = sphi %s677_s16, %s17_s16   ;;  %s637_s15 = sphi %s675_s15, %s815_s15   ;;  %s633_s14 = sphi %s673_s14, %s814_s14   ;;  %s629_s13 = sphi %s671_s13, %s813_s13   ;;  %s625_s12 = sphi %s669_s12, %s812_s12   ;;  %s621_s11 = sphi %s667_s11, %s811_s11   ;;  %s617_s10 = sphi %s665_s10, %s810_s10   ;;  %s613_s9 = sphi %s663_s9, %s809_s9  }
   0x8   : > { %p707_p1 = scmp.eq.s32.totalorder %s367_s17, 0  ;;  %p102_p2 = scmp.lt.s32.totalorder %s641_s16, 5 }
   0x9   : > { %s113_s21 = sshll.u32 %s804_s1, 4  ;;  %s643_s23 = smov [#allocation9]   ;;  %s114_s21 = int_to_ptr.hbm [resolvable:$true] %s113_s21 }
   0xa   : > { %p715_p3 = pnand %p368_p0, %p102_p2  ;;  %s115_s24 = sshll.u32 %s643_s23, 4  ;;  %s116_s24 = int_to_ptr.vmem [resolvable:$true] %s115_s24 }
   0xb   : > { %s644_s25 = smov 128   ;;  %s645_s26 = smov 8  }
   0xc   : > { %p393_p4 = pneg %p715_p3  ;;  %s26_s27 = sadd.s32 1, %s633_s14 }
   0xd   : > { %p27_p6 = scmp.ge.s32.totalorder %s26_s27, 2  ;;  %s29_s28 = sadd.s32 1, %s637_s15 }
   0xe   : > { %p394_p5 = pnand %p393_p4, %p707_p1  ;;  %s36_s29 = sadd.s32 1, %s621_s11 }
   0xf   : > { %p43_p7 = scmp.ne.s32.totalorder %s621_s11, %s617_s10  ;;  %s817_s27 = smov (%p27_p6, %s26_s27), 0 }
  0x10   : > { %396 = dma.hbm_to_vmem [thread:$0]  (!%p394_p5), %s114_s21, 512, %s116_s24, [#allocation10], %s644_s25, %s644_s25, %s645_s26  }
  0x11   : > { %s819_s28 = smov (!%p27_p6, %s29_s28), %s637_s15  ;;  %s33_s30 = ssub.s32 %s633_s14, %s817_s27 }
  0x12   : > { %p44_p8 = scmp.eq.s32.totalorder %s641_s16, 0  ;;  %p31_p9 = scmp.ge.s32.totalorder %s819_s28, 2 }
  0x13   : > { %p34_p10 = scmp.eq.s32.totalorder %s33_s30, 0  ;;  %p49_p11 = scmp.ne.s32.totalorder %s617_s10, %s613_s9 }
  0x14   : > { %s821_s28 = smov (%p31_p9, %s819_s28), 0  ;;  %p45_p12 = por %p44_p8, %p43_p7 }
  0x15   : > { %s739_s3 = scalar_select %p34_p10, %s621_s11, %s36_s29  }
  0x16   : > { %p743_p13 = por %p707_p1, %p49_p11  ;;  %s129_s5 = sand.u32 1, %s621_s11  }
  0x17   : > { %s372_s6 = sshll.u32 %s633_s14, 3  ;;  %p402_p0 = scmp.lt.s32.totalorder %s641_s16, 4 }
  0x18   : > { %s371_s7 = sshll.u32 %s129_s5, 3  ;;  %s137_s20 = scalar_lea.hbm %s803_s0, %s372_s6 }
  0x19   : > { %s139_s21 = sshll.u32 %s137_s20, 4  ;;  %s133_s9 = scalar_lea.vmem [#allocation6], %s371_s7  ;;  %s140_s21 = int_to_ptr.hbm [resolvable:$true] %s139_s21 }
  0x1a   : > { %s141_s23 = sshll.u32 %s133_s9, 4  ;;  %p398_p2 = pnand %p402_p0, %p45_p12  ;;  %s142_s23 = int_to_ptr.vmem [resolvable:$true] %s141_s23 }
  0x1b   : > { %s130_s24 = scalar_lea.sflag [#allocation7], %s129_s5  ;;  %150 = sbr.rel (%p715_p3) target bundleno = 272 (0x110), region = 28 }
  0x1c   : > { %400 = dma.hbm_to_vmem [thread:$0]  (!%p398_p2), %s140_s21, 128, %s142_s23, %s130_s24  }
  0x1d   : > { %s152_s25 = sand.u32 (!%p715_p3), 1, %s617_s10  }
  0x1e   : > { %s374_s26 = sshll.u32 (!%p715_p3), %s152_s25, 3  ;;  %s153_s29 = scalar_lea.sflag (!%p715_p3), [#allocation7], %s152_s25 }
  0x1f   : > { %s156_s30 = scalar_lea.vmem (!%p715_p3), [#allocation6], %s374_s26 }
  0x20   : > { %600 = dma.done.wait (%p743_p13), %s153_s29, 128  }
  0x21   : > { %602 = vsyncadd (%p743_p13), %s153_s29, 4294967168 }
  0x22   : > { %604 = dma.done.wait (%p707_p1), [#allocation10], 512  }
  0x23   : > { %606 = vsyncadd (%p707_p1), [#allocation10], 4294966784  ;;  %p178_p3 = scmp.eq.s32.totalorder %s629_s13, 0  ;;  %p179_p4 = scmp.eq.s32.totalorder %s625_s12, 0 }
  0x25   : > { %p180_p5 = pnand %p179_p4, %p178_p3 }
  0x27   : > { %183 = sbr.rel (%p180_p5) target bundleno = 47 (0x2f), region = 40 }
  0x2c   : > { %v646_v0 = vmov 0.0  }
  0x2d   : > { %184 = vst [vmem:[#allocation2] sm:$0x1] %v646_v0 }
  0x2e   : > { %185 = vst [vmem:[#allocation3] sm:$0x1] %v646_v0 }
  0x2f PF: > { %v190_v1 = vld [vmem:[#allocation9 + $0x18] sm:$0xff]  ;;  %v189_v2 = vld [vmem:[#allocation9 + $0x10] sm:$0xff]  ;;  %v188_v3 = vld [vmem:[#allocation9 + $0x8] sm:$0xff]  ;;  %vm191_vm0 = vcmask 261120   ;;  %p377_p1 = scmp.ne.s32.totalorder %s629_s13, 0 }
  0x30   : > { %207 = vmatpush.msra.mxu0 %v190_v1  ;;  %v187_v4 = vld [vmem:[#allocation9] sm:$0xff]  ;;  %v186_v5 = vld [vmem:[%s156_s30] sm:$0xff] }
  0x32   : > { %208 = vmatpush.msra.mxu0 %v189_v2 }
  0x34   : > { %209 = vmatpush.msra.mxu0 %v188_v3 }
  0x36   : > { %210 = vmatpush.msra.mxu0 %v187_v4 }
  0x37   : > { %376 = vmatmul.msk.f32.vlgmr.msra.gmra.mxu0 %vm191_vm0, %v186_v5 }
  0xb0   : > { %217 = sbr.rel (%p377_p1) target bundleno = 198 (0xc6), region = 44 }
  0xb4   : > { %v212_v6 = vpop.f32.mrf.mxu0 }
  0xb5   : > { %v219_v7 = vrot.slane %v212_v6, 4  ;;  %v228_v8 = vmul.f32 %v212_v6, %v212_v6  ;;  %v218_v17 = vld [vmem:[#allocation2] sm:$0x1]  ;;  %v227_v20 = vld [vmem:[#allocation3] sm:$0x1] }
  0xb7   : > { %v220_v9 = vadd.f32 %v219_v7, %v212_v6  ;;  %v229_v10 = vrot.slane %v228_v8, 4 }
  0xb9   : > { %v221_v11 = vrot.slane %v220_v9, 2  ;;  %v230_v12 = vadd.f32 %v229_v10, %v228_v8 }
  0xbb   : > { %v222_v13 = vadd.f32 %v221_v11, %v220_v9  ;;  %v231_v14 = vrot.slane %v230_v12, 2 }
  0xbd   : > { %v223_v15 = vrot.slane %v222_v13, 1  ;;  %v232_v16 = vadd.f32 %v231_v14, %v230_v12 }
  0xbf   : > { %v224_v18 = vadd.f32 %v223_v15, %v222_v13  ;;  %v233_v19 = vrot.slane %v232_v16, 1 }
  0xc1   : > { %v225_v21 = vadd.f32 %v224_v18, %v218_v17  ;;  %v234_v22 = vadd.f32 %v233_v19, %v232_v16 }
  0xc3   : > { %226 = vst [vmem:[#allocation2] sm:$0x1] %v225_v21  ;;  %v235_v23 = vadd.f32 %v234_v22, %v227_v20 }
  0xc5   : > { %236 = vst [vmem:[#allocation3] sm:$0x1] %v235_v23 }
  0xc6 PF: > { %p237_p6 = scmp.eq.s32.totalorder %s629_s13, 1 }
  0xc8   : > { %p238_p7 = pnand %p237_p6, %p179_p4 }
  0xca   : > { %241 = sbr.rel (%p238_p7) target bundleno = 237 (0xed), region = 48 }
  0xcf   : > { %v242_v24 = vld [vmem:[#allocation2] sm:$0x1]  ;;  %v244_v25 = vld [vmem:[#allocation3] sm:$0x1] }
  0xd0   : > { %v243_v26 = vmul.f32 0.0625, %v242_v24  ;;  %v245_v27 = vmul.f32 0.0625, %v244_v25 }
  0xd2   : > { %v246_v28 = vmul.f32 %v243_v26, %v243_v26 }
  0xd4   : > { %v247_v29 = vsub.f32 %v245_v27, %v246_v28 }
  0xd6   : > { %v248_v30 = vadd.f32 1e-05, %v247_v29 }
  0xd8   : > { %475 = vrsqrt.f32 %v248_v30  ;;  %vm255_vm1 = vweird.f32 %v248_v30 }
  0xde   : > { %v476_v31 = vpop.eup %475 }
  0xdf   : > { %v250_v32 = vmul.f32 %v476_v31, %v248_v30  ;;  %vm256_vm2 = vweird.f32 %v476_v31 }
  0xe0   : > { %vm257_vm3 = vmor %vm255_vm1, %vm256_vm2 }
  0xe1   : > { %v251_v33 = vmul.f32 %v476_v31, %v250_v32 }
  0xe3   : > { %v252_v34 = vmul.f32 0.5, %v251_v33 }
  0xe5   : > { %v253_v35 = vsub.f32 1.5, %v252_v34 }
  0xe7   : > { %v254_v36 = vmul.f32 %v476_v31, %v253_v35 }
  0xe9   : > { %v258_v37 = vsel %vm257_vm3, %v476_v31, %v254_v36 }
  0xea   : > { %259 = vst [vmem:[#allocation4] sm:$0x1] %v258_v37  ;;  %v260_v38 = vmul.f32 %v258_v37, %v243_v26 }
  0xec   : > { %261 = vst [vmem:[#allocation5] sm:$0x1] %v260_v38 }
  0xed PF: > { %p378_p8 = scmp.ne.s32.totalorder %s629_s13, 1 }
  0xee   : > { %s283_s18 = scalar_lea.vmem (!%p378_p8), [#allocation11], %s625_s12 }
  0xef   : > { %264 = sbr.rel (%p378_p8) target bundleno = 266 (0x10a), region = 52 }
  0xf4   : > { %v477_v39 = vld [vmem:[#allocation4] ss:$0 sm:$0xff]  ;;  %v478_v40 = vld [vmem:[#allocation5] ss:$0 sm:$0xff] }
  0xf5   : > { %v269_v41 = vmul.f32 %v477_v39, %v212_v6 }
  0xf7   : > { %v274_v42 = vsub.f32 %v269_v41, %v478_v40 }
  0xf9   : > { %v275_v43 = vmax.f32 %v274_v42, 0.0 }
  0xfb   : > { %v276_v44 = vrot.slane %v275_v43, 4 }
  0xfd   : > { %v277_v45 = vadd.f32 %v276_v44, %v275_v43 }
  0xff   : > { %v278_v46 = vrot.slane %v277_v45, 2 }
 0x101   : > { %v279_v47 = vadd.f32 %v278_v46, %v277_v45 }
 0x103   : > { %v280_v48 = vrot.slane %v279_v47, 1 }
 0x105   : > { %v281_v49 = vadd.f32 %v280_v48, %v279_v47 }
 0x107   : > { %v282_v50 = vmul.f32 0.125, %v281_v49 }
 0x109   : > { %284 = vst [vmem:[%s283_s18] sm:$0x1] %v282_v50 }
 0x10a PF: > { %p404_p9 = scmp.eq.s32.totalorder %s367_s17, 3  ;;  %s293_s4 = sshll.u32 %s805_s2, 4  ;;  %s294_s4 = int_to_ptr.hbm [resolvable:$true] %s293_s4 }
 0x10b   : > { %s647_s5 = smov [#allocation11]  }
 0x10c   : > { %s291_s6 = sshll.u32 %s647_s5, 4  ;;  %s292_s6 = int_to_ptr.vmem [resolvable:$true] %s291_s6 }
 0x10d   : > { %390 = dma.vmem_to_hbm [thread:$0]  (%p404_p9), %s292_s6, 32, %s294_s4, [#allocation8]  }
 0x10e   : > { %608 = dma.done.wait (%p404_p9), [#allocation8], 32  }
 0x10f   : > { %610 = vsyncadd (%p404_p9), [#allocation8], 4294967264 }
 0x110 PF: > { %s17_s16 = sadd.s32 1, %s641_s16   ;;  %s809_s9 = smov %s617_s10 }
 0x111   : > { %p14_p10 = scmp.ge.s32.totalorder %s17_s16, 6   ;;  %s810_s10 = smov %s621_s11 }
 0x112   : > { %s811_s11 = smov %s739_s3  ;;  %s812_s12 = smov %s633_s14 }
 0x113   : > { %s813_s13 = smov %s637_s15  ;;  %s814_s14 = smov %s817_s27 }
 0x114   : > { %s815_s15 = smov %s821_s28  ;;  %16 = sbr.rel (!%p14_p10) target bundleno = 7 (0x7), region = 86 }
 0x119   :  { %307 = vsyncpa [#allocation7], 1 }
 0x11a   :  { %309 = vsyncpa [#allocation7 + $0x1], 1 }
 0x11b   :  { %310 = vsyncpa [#allocation10], 1 }
 0x11c   :  { %311 = vsyncpa [#allocation8], 1 }
 0x11d   :  { %313 = vsyncpa [#allocation8 + $0x1], 1 }

</bundles_post_ra>
